<compile_context>
chip_gen: v5e
topology: v5e:2x2
jax: 0.10.0
libtpu: 0.0.40
codegen_flags: <defaults>
</compile_context>

<pallas_src>
import jax
import jax.numpy as jnp
from jax.experimental import pallas as pl
from jax.experimental.pallas import tpu as pltpu

EPS = 1e-6


def _layernorm_kernel(alpha_ref, bias_ref, x_ref, o_ref):
    # alpha_ref / bias_ref: SMEM scalars of shape (1,)
    # x_ref / o_ref: VMEM tile of shape (TM, H); the last grid step may be a partial block
    # (OOB rows hold unspecified data — safe because every statistic below is per-row).
    x = x_ref[...].astype(jnp.float32)
    n = x.shape[-1]
    # Two-pass statistics: mean, then centered sum-of-squares (no cancellation, no clamp).
    mean = jnp.sum(x, axis=-1, keepdims=True) * (1.0 / n)
    centered = x - mean
    # torch.std default uses Bessel's correction (ddof = 1); eps is added to std.
    # (For H == 1 torch yields NaN; we guard the static divisor to avoid a trace-time
    #  ZeroDivisionError — that degenerate case then returns `bias` instead of NaN.)
    ddof_div = (n - 1) if n > 1 else 1
    var = jnp.sum(centered * centered, axis=-1, keepdims=True) * (1.0 / ddof_div)
    std = jnp.sqrt(var)
    # Per-row scale; applied as one mul + add per element on the VPU.
    scale = alpha_ref[0] / (std + EPS)
    o_ref[...] = (centered * scale + bias_ref[0]).astype(o_ref.dtype)


def _sublane_multiple(dtype) -> int:
    # Rows per sublane pack: 8 for 4-byte dtypes, 16 for bf16/fp16, 32 for int8/fp8.
    return max(8, 32 // jnp.dtype(dtype).itemsize)


def _vmem_capacity_bytes() -> int:
    try:
        info = pltpu.get_tpu_info()
        cap = getattr(info, "vmem_capacity_bytes", None)
        if cap:
            return int(cap)
    except Exception:
        pass
    return 64 * 1024 * 1024  # conservative fallback (v7x per-TC VMEM)


def _vmem_budget_bytes() -> int:
    # Footprint target for block selection: ~45% of physical VMEM, capped at 64 MiB.
    # v5e/v6e (128 MiB) -> ~57 MiB; v7x (64 MiB) -> ~28 MiB.
    cap = _vmem_capacity_bytes()
    return int(min(64 * 1024 * 1024, (cap * 45) // 100))


def _choose_row_tile(rows: int, hidden: int, dtype) -> int:
    sub = _sublane_multiple(dtype)
    itemsize = jnp.dtype(dtype).itemsize
    # Per-row VMEM cost: double-buffered input + output in the native dtype plus roughly
    # one live full-tile f32 temporary inside the kernel body.
    bytes_per_row = hidden * (4 * itemsize + 4)
    budget = _vmem_budget_bytes()
    tile = max(sub, budget // max(bytes_per_row, 1))
    # Cap by bytes (not rows): ~8 MiB per input block is well past the ~1 MiB roofline knee.
    max_rows_by_block = max(sub, (8 * 1024 * 1024) // max(hidden * itemsize, 1))
    tile = min(tile, max_rows_by_block)
    # Never tile past the (sublane-rounded) total row count.
    tile = min(tile, pl.cdiv(rows, sub) * sub)
    # Prefer >= 4 grid steps (>= 2 per TensorCore on v7x) so megacore sharding keeps
    # DMA/compute double-buffering alive on both cores.
    if rows >= 4 * sub and pl.cdiv(rows, tile) < 4:
        tile = max(sub, (pl.cdiv(rows, 4) // sub) * sub)
    tile = max(sub, (tile // sub) * sub)
    return int(tile)


def layer_normalization(x, alpha, bias, *, row_tile=None):
    """x: (..., H). alpha, bias: shape-(1,) scalars (mirrors nn.Parameter(torch.ones(1)))."""
    orig_shape = x.shape
    H = orig_shape[-1]
    x2 = x.reshape(-1, H)
    R = x2.shape[0]

    sub = _sublane_multiple(x.dtype)
    if row_tile is None:
        tile = _choose_row_tile(R, H, x.dtype)
    else:
        tile = max(sub, (int(row_tile) // sub) * sub)

    grid = (pl.cdiv(R, tile),)  # no padding / slicing: boundary block is masked by Pallas

    itemsize = jnp.dtype(x.dtype).itemsize
    # Real double-buffered in+out footprint plus headroom for in-kernel temporaries.
    footprint = tile * H * (4 * itemsize + 4)
    cap = _vmem_capacity_bytes()
    vmem_limit = int(min((cap * 9) // 10, max(32 * 1024 * 1024, int(footprint * 1.25))))

    out = pl.pallas_call(
        _layernorm_kernel,
        out_shape=jax.ShapeDtypeStruct((R, H), x.dtype),
        grid_spec=pltpu.PrefetchScalarGridSpec(
            num_scalar_prefetch=0,
            grid=grid,
            in_specs=[
                pl.BlockSpec(memory_space=pltpu.SMEM),          # alpha (scalar)
                pl.BlockSpec(memory_space=pltpu.SMEM),          # bias  (scalar)
                pl.BlockSpec((tile, H), lambda i: (i, 0)),      # x tile (lane-dense when H % 128 == 0)
            ],
            out_specs=pl.BlockSpec((tile, H), lambda i: (i, 0)),
        ),
        compiler_params=pltpu.CompilerParams(
            dimension_semantics=("parallel",),
            vmem_limit_bytes=vmem_limit,
        ),
    )(alpha, bias, x2)

    return out.reshape(orig_shape)


def _reference(x, alpha, bias):
    mean = jnp.mean(x, axis=-1, keepdims=True)
    H = x.shape[-1]
    std = jnp.sqrt(jnp.sum((x - mean) ** 2, axis=-1, keepdims=True) / (H - 1))
    return alpha[0] * (x - mean) / (std + EPS) + bias[0]


if __name__ == "__main__":
    key = jax.random.PRNGKey(0)

    # Deterministic parameter init matching nn.Parameter(torch.ones(1)) / torch.zeros(1)
    alpha = jnp.ones((1,), dtype=jnp.float32)
    bias = jnp.zeros((1,), dtype=jnp.float32)

    # Case 1: module-consistent small shape (batch=2, seq=8, hidden=32)
    k1, k2 = jax.random.split(key)
    x1 = jax.random.normal(k1, (2, 8, 32), dtype=jnp.float32)
    y1 = layer_normalization(x1, alpha, bias)
    jax.block_until_ready(y1)
    assert jnp.allclose(y1, _reference(x1, alpha, bias), atol=1e-4, rtol=1e-4), "mismatch (case 1)"

    # Case 2: lane-dense H and a row count that exercises the masked boundary block
    x2 = jax.random.normal(k2, (3, 10, 128), dtype=jnp.float32)
    y2 = layer_normalization(x2, alpha, bias)
    jax.block_until_ready(y2)
    assert jnp.allclose(y2, _reference(x2, alpha, bias), atol=1e-4, rtol=1e-4), "mismatch (case 2)"

    print("KERNEL_OK")
</pallas_src>

<mosaic_0001>
module attributes {stable_mosaic.version = 11 : i64} {
  func.func @_layernorm_kernel(%arg0: i32, %arg1: memref<1xf32, #tpu.memory_space<smem>>, %arg2: memref<1xf32, #tpu.memory_space<smem>>, %arg3: memref<16x32xf32, #tpu.memory_space<vmem>>, %arg4: memref<16x32xf32, #tpu.memory_space<vmem>>) attributes {dimension_semantics = [#tpu.dimension_semantics<parallel>], iteration_bounds = array<i64: 1>, scalar_prefetch = 0 : i64, scratch_operands = 0 : i64, tpu.core_type = #tpu.core_type<tc>, window_params = [{transform_indices = @transform_0, window_bounds = array<i64: 1>}, {transform_indices = @transform_1, window_bounds = array<i64: 1>}, {transform_indices = @transform_2, window_bounds = array<i64: 16, 32>}, {transform_indices = @transform_3, window_bounds = array<i64: 16, 32>}]} {
    %c0 = arith.constant 0 : index
    %c0_0 = arith.constant 0 : index
    %0 = vector.load %arg3[%c0, %c0_0] : memref<16x32xf32, #tpu.memory_space<vmem>>, vector<16x32xf32>
    %cst = arith.constant dense<0.000000e+00> : vector<16xf32>
    %1 = vector.multi_reduction <add>, %0, %cst [1] : vector<16x32xf32> to vector<16xf32>
    %2 = vector.shape_cast %1 : vector<16xf32> to vector<16x1xf32>
    %cst_1 = arith.constant 3.125000e-02 : f32
    %3 = vector.broadcast %cst_1 : f32 to vector<16x1xf32>
    %4 = arith.mulf %2, %3 : vector<16x1xf32>
    %5 = vector.broadcast %4 : vector<16x1xf32> to vector<16x32xf32>
    %6 = arith.subf %0, %5 : vector<16x32xf32>
    %7 = arith.mulf %6, %6 : vector<16x32xf32>
    %cst_2 = arith.constant dense<0.000000e+00> : vector<16xf32>
    %8 = vector.multi_reduction <add>, %7, %cst_2 [1] : vector<16x32xf32> to vector<16xf32>
    %9 = vector.shape_cast %8 : vector<16xf32> to vector<16x1xf32>
    %cst_3 = arith.constant 0.0322580636 : f32
    %10 = vector.broadcast %cst_3 : f32 to vector<16x1xf32>
    %11 = arith.mulf %9, %10 : vector<16x1xf32>
    %12 = math.sqrt %11 : vector<16x1xf32>
    %c0_4 = arith.constant 0 : index
    %13 = memref.load %arg1[%c0_4] : memref<1xf32, #tpu.memory_space<smem>>
    %cst_5 = arith.constant 9.99999997E-7 : f32
    %14 = vector.broadcast %cst_5 : f32 to vector<16x1xf32>
    %15 = arith.addf %12, %14 : vector<16x1xf32>
    %16 = vector.broadcast %13 : f32 to vector<16x1xf32>
    %17 = arith.divf %16, %15 : vector<16x1xf32>
    %18 = vector.broadcast %17 : vector<16x1xf32> to vector<16x32xf32>
    %19 = arith.mulf %6, %18 : vector<16x32xf32>
    %c0_6 = arith.constant 0 : index
    %20 = memref.load %arg2[%c0_6] : memref<1xf32, #tpu.memory_space<smem>>
    %21 = vector.broadcast %20 : f32 to vector<16x32xf32>
    %22 = arith.addf %19, %21 : vector<16x32xf32>
    %c0_7 = arith.constant 0 : index
    %c0_8 = arith.constant 0 : index
    %23 = vector.load %arg4[%c0_7, %c0_8] : memref<16x32xf32, #tpu.memory_space<vmem>>, vector<16x32xf32>
    tpu.vector_store %arg4[%c0_7, %c0_8], %22 {strides = array<i32>} : memref<16x32xf32, #tpu.memory_space<vmem>>, vector<16x32xf32>,
    return
  }
  func.func @transform_0(%arg0: i32) -> i32 {
    %c0_i32 = arith.constant 0 : i32
    %c0_i32_0 = arith.constant 0 : i32
    return %c0_i32 : i32
  }
  func.func @transform_1(%arg0: i32) -> i32 {
    %c0_i32 = arith.constant 0 : i32
    %c0_i32_0 = arith.constant 0 : i32
    return %c0_i32 : i32
  }
  func.func @transform_2(%arg0: i32) -> (i32, i32) {
    %c0_i32 = arith.constant 0 : i32
    %c0_i32_0 = arith.constant 0 : i32
    return %arg0, %c0_i32 : i32, i32
  }
  func.func @transform_3(%arg0: i32) -> (i32, i32) {
    %c0_i32 = arith.constant 0 : i32
    %c0_i32_0 = arith.constant 0 : i32
    return %arg0, %c0_i32 : i32, i32
  }
}

</mosaic_0001>

<bundles_post_ra>
// kernel: tpu_custom_call.1
= control target key start
LH: loop header
LB: loop body
LE: loop exit
PB: predicated region body
PF: predicated region fallthrough
CT: control target
= control target key end

     0   :  { %10 = vsyncpa [#allocation5], 0  ;;  %s263_s0 = inlined_call_operand.<no memory space> [shape: f32[1], index: 0, kind: input, shape index: {}]   ;;  %s264_s1 = inlined_call_operand.<no memory space> [shape: f32[1], index: 1, kind: input, shape index: {}]   ;;  %s265_s2 = inlined_call_operand.hbm [shape: f32[16,32], index: 2, kind: input, shape index: {}]   ;;  %s266_s3 = inlined_call_operand.hbm [shape: f32[16,32], index: 3, kind: output, shape index: {}]  }
   0x1   :  { %11 = vsyncpa [#allocation6], 0  ;;  %s20_s14 = sshll.u32 %s265_s2, 4  ;;  %s205_s15 = smov [#allocation4]   ;;  %s21_s14 = int_to_ptr.hbm [resolvable:$true] %s20_s14 }
   0x2   :  { %s22_s16 = sshll.u32 %s205_s15, 4  ;;  %s206_s17 = smov 128   ;;  %s23_s16 = int_to_ptr.vmem [resolvable:$true] %s22_s16 }
   0x3   :  { %s207_s18 = smov 8  }
   0x4   :  { %28 = dma.hbm_to_vmem [thread:$0]  %s21_s14, 256, %s23_s16, [#allocation5], %s206_s17, %s206_s17, %s207_s18  }
   0x5   :  { %201 = dma.done.wait [#allocation5], 256  }
   0x6   :  { %202 = vsyncadd [#allocation5], 4294967040  ;;  %vm35_vm0 = vcmask 261120   ;;  %v33_v0 = vld [vmem:[#allocation4] sm:$0xff]  ;;  %v34_v2 = vld [vmem:[#allocation4 + $0x8] sm:$0xff]  ;;  %v83_v48 = vstv %s263_s0  ;;  %v117_v56 = vstv %s264_s1  ;;  %s208_s0 = smov [#allocation7]  }
   0x7   :  { %v36_v1 = vsel %vm35_vm0, %v33_v0, 0.0  ;;  %v39_v3 = vsel %vm35_vm0, %v34_v2, 0.0  ;;  %s126_s22 = sshll.u32 %s208_s0, 4  ;;  %s128_s24 = sshll.u32 %s266_s3, 4  ;;  %s127_s22 = int_to_ptr.vmem [resolvable:$true] %s126_s22  ;;  %s129_s24 = int_to_ptr.hbm [resolvable:$true] %s128_s24 }
   0x8   :  { %37 = vadd.xlane.f32.xlu0 %v36_v1 }
  0x10   :  { %40 = vadd.xlane.f32.xlu0 %v39_v3 }
  0x7b   :  { %v38_v4 = vpop.xlane.xlu0 %37 }
  0x7c   :  { %v42_v5 = vmul.f32 0.03125, %v38_v4 }
  0x7e   :  { %v237_v6 = vsub.f32 %v33_v0, %v42_v5 }
  0x80   :  { %v46_v7 = vmul.f32 %v237_v6, %v237_v6 }
  0x82   :  { %v48_v8 = vsel %vm35_vm0, %v46_v7, 0.0 }
  0x83   :  { %49 = vadd.xlane.f32.xlu1 %v48_v8  ;;  %v41_v9 = vpop.xlane.xlu0 %40 }
  0x84   :  { %v43_v10 = vmul.f32 0.03125, %v41_v9 }
  0x86   :  { %v242_v11 = vsub.f32 %v34_v2, %v43_v10 }
  0x88   :  { %v47_v12 = vmul.f32 %v242_v11, %v242_v11 }
  0x8a   :  { %v51_v13 = vsel %vm35_vm0, %v47_v12, 0.0 }
  0x8b   :  { %52 = vadd.xlane.f32.xlu1 %v51_v13 }
  0xf6   :  { %v50_v14 = vpop.xlane.xlu1 %49 }
  0xf7   :  { %v54_v15 = vmul.f32 0.032258064, %v50_v14 }
  0xf9   :  { %145 = vrsqrt.f32 %v54_v15  ;;  %vm63_vm1 = vcmp.eq.f32.partialorder %v54_v15, inf  ;;  %v66_v28 = vand.u32 2147483648, %v54_v15  ;;  %vm65_vm2 = vcmp.eq.f32.partialorder %v54_v15, 0.0 }
  0xfe   :  { %v53_v16 = vpop.xlane.xlu1 %52 }
  0xff   :  { %v146_v17 = vpop.eup %145  ;;  %v55_v18 = vmul.f32 0.032258064, %v53_v16 }
 0x100   :  { %v57_v19 = vmul.f32 %v146_v17, %v54_v15 }
 0x101   :  { %147 = vrsqrt.f32 %v55_v18  ;;  %vm75_vm3 = vcmp.eq.f32.partialorder %v55_v18, inf  ;;  %v78_v36 = vand.u32 2147483648, %v55_v18  ;;  %vm77_vm4 = vcmp.eq.f32.partialorder %v55_v18, 0.0 }
 0x102   :  { %v58_v20 = vmul.f32 %v146_v17, %v57_v19 }
 0x104   :  { %v59_v21 = vmul.f32 0.5, %v58_v20 }
 0x106   :  { %v60_v22 = vsub.f32 1.5, %v59_v21 }
 0x107   :  { %v148_v23 = vpop.eup %147 }
 0x108   :  { %v61_v24 = vmul.f32 %v146_v17, %v60_v22  ;;  %v69_v25 = vmul.f32 %v148_v23, %v55_v18 }
 0x10a   :  { %v62_v26 = vmul.f32 %v61_v24, %v54_v15  ;;  %v70_v27 = vmul.f32 %v148_v23, %v69_v25 }
 0x10c   :  { %v64_v29 = vsel %vm63_vm1, %v54_v15, %v62_v26  ;;  %v71_v30 = vmul.f32 0.5, %v70_v27 }
 0x10d   :  { %v67_v31 = vsel %vm65_vm2, %v66_v28, %v64_v29 }
 0x10e   :  { %v81_v32 = vadd.f32 1e-06, %v67_v31  ;;  %v72_v33 = vsub.f32 1.5, %v71_v30 }
 0x110   :  { %149 = vrcp.f32 %v81_v32  ;;  %v73_v34 = vmul.f32 %v148_v23, %v72_v33  ;;  %v95_v43 = vand.u32 2147483648, %v81_v32  ;;  %v93_v45 = vand.u32 2147483647, %v81_v32 }
 0x111   :  { %vm89_vm6 = vweird.f32 %v81_v32 }
 0x112   :  { %v74_v35 = vmul.f32 %v73_v34, %v55_v18  ;;  %v96_v49 = vor.u32 1.1754944e-38, %v95_v43  ;;  %vm94_vm8 = vcmp.eq.f32.partialorder %v93_v45, 8.507059e+37 }
 0x114   :  { %v76_v37 = vsel %vm75_vm3, %v55_v18, %v74_v35 }
 0x115   :  { %v79_v38 = vsel %vm77_vm4, %v78_v36, %v76_v37 }
 0x116   :  { %v150_v39 = vpop.eup %149  ;;  %v82_v40 = vadd.f32 1e-06, %v79_v38 }
 0x117   :  { %v85_v41 = vmul.f32 %v150_v39, %v81_v32  ;;  %vm90_vm5 = vweird.f32 %v150_v39 }
 0x118   :  { %151 = vrcp.f32 %v82_v40  ;;  %vm91_vm7 = vmor %vm89_vm6, %vm90_vm5  ;;  %v110_v55 = vand.u32 2147483648, %v82_v40  ;;  %v108_v58 = vand.u32 2147483647, %v82_v40  ;;  %vm104_vm10 = vweird.f32 %v82_v40 }
 0x119   :  { %v86_v42 = vsub.f32 1.0, %v85_v41 }
 0x11a   :  { %v111_v62 = vor.u32 1.1754944e-38, %v110_v55  ;;  %vm109_vm12 = vcmp.eq.f32.partialorder %v108_v58, 8.507059e+37 }
 0x11b   :  { %v87_v44 = vmul.f32 %v150_v39, %v86_v42 }
 0x11d   :  { %v88_v46 = vadd.f32 %v150_v39, %v87_v44 }
 0x11e   :  { %v152_v47 = vpop.eup %151 }
 0x11f   :  { %v92_v50 = vsel %vm91_vm7, %v150_v39, %v88_v46  ;;  %v100_v51 = vmul.f32 %v152_v47, %v82_v40  ;;  %vm105_vm9 = vweird.f32 %v152_v47 }
 0x120   :  { %v97_v52 = vsel %vm94_vm8, %v96_v49, %v92_v50  ;;  %vm106_vm11 = vmor %vm104_vm10, %vm105_vm9 }
 0x121   :  { %v98_v53 = vmul.f32 %v97_v52, %v83_v48  ;;  %v101_v54 = vsub.f32 1.0, %v100_v51 }
 0x123   :  { %v102_v57 = vmul.f32 %v152_v47, %v101_v54  ;;  %v114_v59 = vmul.f32 %v98_v53, %v237_v6 }
 0x125   :  { %v103_v60 = vadd.f32 %v152_v47, %v102_v57  ;;  %v118_v61 = vadd.f32 %v117_v56, %v114_v59 }
 0x127   :  { %v107_v63 = vsel %vm106_vm11, %v152_v47, %v103_v60  ;;  %120 = vst.msk [vmem:[#allocation7] sm:$0xff] %vm35_vm0, %v118_v61 }
 0x128   :  { %v112_v0 = vsel %vm109_vm12, %v111_v62, %v107_v63 }
 0x129   :  { %v113_v1 = vmul.f32 %v112_v0, %v83_v48 }
 0x12b   :  { %v115_v2 = vmul.f32 %v113_v1, %v242_v11 }
 0x12d   :  { %v119_v3 = vadd.f32 %v117_v56, %v115_v2 }
 0x12f   :  { %121 = vst.msk [vmem:[#allocation7 + $0x8] sm:$0xff] %vm35_vm0, %v119_v3 }
 0x130   :  { %134 = dma.vmem_to_hbm [thread:$0]  %s127_s22, 256, %s129_s24, [#allocation6], %s206_s17, %s206_s17, %s207_s18  }
 0x131   :  { %203 = dma.done.wait [#allocation6], 256  }
 0x132   :  { %204 = vsyncadd [#allocation6], 4294967040 }
 0x133   :  { %139 = vsyncpa [#allocation5], 1 }
 0x134   :  { %140 = vsyncpa [#allocation6], 1 }

</bundles_post_ra>
